<compile_context>
chip_gen: v6e
topology: v6e:2x2x1
jax: 0.10.0
libtpu: 0.0.40
codegen_flags: <defaults>
</compile_context>

<pallas_src>
import jax
import jax.numpy as jnp
from jax.experimental import pallas as pl
from jax.experimental.pallas import tpu as pltpu

_LANE = 128
_SUBLANE_BYTES = 32  # 8 sublanes x 4 bytes: packed dtypes need 8 * (4/itemsize) rows


def _round_up(v, m):
    return ((v + m - 1) // m) * m


def _embedding_kernel(idx_ref, table_ref, out_ref):
    # idx_ref:   (TN, 1)  int32          -- block of flattened position ids
    # table_ref: (P, H)   table dtype    -- full embedding table (constant across grid)
    # out_ref:   (TN, H)  table dtype    -- gathered rows
    idx = idx_ref[...]                                   # (TN, 1)
    num_pos = table_ref.shape[0]
    acc = jnp.zeros(out_ref.shape, jnp.float32)
    # Unrolled VPU select/accumulate; num_pos is tiny (the module hard-codes 3).
    for p in range(num_pos):
        row = table_ref[pl.ds(p, 1), :].astype(jnp.float32)   # (1, H) static slice
        sel = (idx == p).astype(jnp.float32)                   # (TN, 1)
        acc = acc + sel * row
    out_ref[...] = acc.astype(out_ref.dtype)


def _vmem_capacity_bytes():
    try:
        return int(pltpu.get_tpu_info().vmem_capacity_bytes)
    except Exception:
        return 64 * 1024 * 1024  # conservative fallback (v7x per-TC VMEM)


def _vmem_footprint_bytes(tile_n, num_pos, hidden_dim, itemsize):
    """Resident VMEM estimate per pipeline step ((8,128)-tiled layout)."""
    out_blk = tile_n * _round_up(hidden_dim, _LANE) * itemsize
    idx_blk = tile_n * _LANE * 4                    # (tile_n, 1) int32 lane-pads to 128
    tbl_blk = _round_up(num_pos, 8) * _round_up(hidden_dim, _LANE) * itemsize
    acc_blk = tile_n * _round_up(hidden_dim, _LANE) * 4   # f32 accumulator
    # Pipelined blocks are double-buffered; accumulator is single.
    return 2 * (out_blk + idx_blk + tbl_blk) + acc_blk


def _choose_tile_n(n, num_pos, hidden_dim, itemsize, budget_bytes,
                   *, align=256, max_tile=1024):
    sub = max(8, _SUBLANE_BYTES // itemsize)        # 8 (f32), 16 (bf16), 32 (int8)
    n_sub = _round_up(max(n, 1), sub)
    if n_sub <= align:
        # Small N: a single block of exactly the needed (sublane-rounded) rows.
        # The kernel is writeback-bound, so there is no MXU-pass-height argument
        # for padding up to 256; this avoids up to ~16x wasted output writeback.
        return n_sub
    # Large N: big aligned tiles to amortize per-step overhead, capped so the row
    # grid has >= 2 steps (lets v7x's two TensorCores split the "parallel" axis).
    t = min(max_tile, _round_up(pl.cdiv(n, 2), align))
    t = max(t, align)
    while t > align and _vmem_footprint_bytes(t, num_pos, hidden_dim, itemsize) > budget_bytes:
        t -= align
    return t


def position_embedding(x, table, *, tile_n=None):
    """Pallas equivalent of PositionEmbedding.forward: table[x].

    x:     integer array of arbitrary shape (values in [0, num_pos))
    table: (num_pos, hidden_dim) embedding weights
    returns: array of shape x.shape + (hidden_dim,), dtype = table.dtype
    """
    num_pos, hidden_dim = table.shape
    out_dtype = table.dtype
    itemsize = jnp.dtype(out_dtype).itemsize
    orig_shape = x.shape

    idx = x.reshape(-1, 1).astype(jnp.int32)        # (N, 1) lane-dense index column
    n = idx.shape[0]

    capacity = _vmem_capacity_bytes()
    budget = capacity // 2                           # 32 MiB on v7x, 64 MiB on v5e/v6e
    if tile_n is None:
        tile_n = _choose_tile_n(n, num_pos, hidden_dim, itemsize, budget)
    else:
        sub = max(8, _SUBLANE_BYTES // itemsize)
        tile_n = _round_up(max(int(tile_n), sub), sub)   # enforce sublane rule

    grid = pl.cdiv(n, tile_n)                        # uneven last block is masked by Pallas
    footprint = _vmem_footprint_bytes(tile_n, num_pos, hidden_dim, itemsize)
    vmem_limit = int(min(budget, max(4 * 1024 * 1024, 2 * footprint)))

    out = pl.pallas_call(
        _embedding_kernel,
        out_shape=jax.ShapeDtypeStruct((n, hidden_dim), out_dtype),
        grid_spec=pltpu.PrefetchScalarGridSpec(
            num_scalar_prefetch=0,
            grid=(grid,),
            in_specs=[
                pl.BlockSpec((tile_n, 1), lambda i: (i, 0)),
                # Constant block index -> Pallas skips re-DMA of the ~3 KiB table
                # after step 0 (single-buffering it is pure hygiene at this size).
                pl.BlockSpec((num_pos, hidden_dim), lambda i: (0, 0)),
            ],
            out_specs=pl.BlockSpec((tile_n, hidden_dim), lambda i: (i, 0)),
        ),
        compiler_params=pltpu.CompilerParams(
            dimension_semantics=("parallel",),
            vmem_limit_bytes=vmem_limit,
        ),
    )(idx, table)

    return out.reshape(*orig_shape, hidden_dim)


if __name__ == "__main__":
    num_pos = 3
    hidden_dim = 256   # module default
    batch, seq = 2, 8

    key = jax.random.PRNGKey(0)
    k_table, k_idx, k_idx2 = jax.random.split(key, 3)

    # nn.Embedding default init: weights ~ N(0, 1)
    table = jax.random.normal(k_table, (num_pos, hidden_dim), dtype=jnp.float32)
    # integer position ids in [0, num_pos)
    x = jax.random.randint(k_idx, (batch, seq), 0, num_pos, dtype=jnp.int32)

    # Small-N path: single 16-row block, grid=1, no padding / slicing.
    out = jax.block_until_ready(position_embedding(x, table))
    ref = jnp.take(table, x, axis=0)
    assert out.shape == (batch, seq, hidden_dim), out.shape
    assert out.dtype == table.dtype, out.dtype
    assert jnp.allclose(out, ref, atol=1e-6), "mismatch vs reference gather"

    # Multi-step grid path: n=2000 -> tile_n=1024, grid=2 with a masked boundary block.
    x2 = jax.random.randint(k_idx2, (4, 500), 0, num_pos, dtype=jnp.int32)
    out2 = jax.block_until_ready(position_embedding(x2, table))
    ref2 = jnp.take(table, x2, axis=0)
    assert out2.shape == (4, 500, hidden_dim), out2.shape
    assert jnp.allclose(out2, ref2, atol=1e-6), "mismatch vs reference gather (tiled)"

    # Dtype-follows-weights path (PyTorch nn.Embedding returns the weight dtype).
    table_bf16 = table.astype(jnp.bfloat16)
    out3 = jax.block_until_ready(position_embedding(x, table_bf16))
    ref3 = jnp.take(table_bf16, x, axis=0)
    assert out3.dtype == jnp.bfloat16, out3.dtype
    assert jnp.allclose(out3.astype(jnp.float32), ref3.astype(jnp.float32)), \
        "mismatch vs reference gather (bf16)"

    print("KERNEL_OK")
</pallas_src>

<mosaic_0001>
module attributes {stable_mosaic.version = 11 : i64} {
  func.func @_embedding_kernel(%arg0: i32, %arg1: memref<16x1xi32, #tpu.memory_space<vmem>>, %arg2: memref<3x256xf32, #tpu.memory_space<vmem>>, %arg3: memref<16x256xf32, #tpu.memory_space<vmem>>) attributes {dimension_semantics = [#tpu.dimension_semantics<parallel>], iteration_bounds = array<i64: 1>, scalar_prefetch = 0 : i64, scratch_operands = 0 : i64, tpu.core_type = #tpu.core_type<tc>, window_params = [{transform_indices = @transform_0, window_bounds = array<i64: 16, 1>}, {pipeline_mode = #tpu.pipeline_mode<synchronous>, transform_indices = @transform_1, window_bounds = array<i64: 3, 256>}, {transform_indices = @transform_2, window_bounds = array<i64: 16, 256>}]} {
    %c0 = arith.constant 0 : index
    %c0_0 = arith.constant 0 : index
    %0 = vector.load %arg1[%c0, %c0_0] : memref<16x1xi32, #tpu.memory_space<vmem>>, vector<16x1xi32>
    %cst = arith.constant 0.000000e+00 : f32
    %1 = vector.broadcast %cst : f32 to vector<16x256xf32>
    %c0_1 = arith.constant 0 : index
    %c0_2 = arith.constant 0 : index
    %2 = vector.load %arg2[%c0_1, %c0_2] : memref<3x256xf32, #tpu.memory_space<vmem>>, vector<1x256xf32>
    %c0_i32 = arith.constant 0 : i32
    %3 = vector.broadcast %c0_i32 : i32 to vector<16x1xi32>
    %4 = arith.cmpi eq, %0, %3 : vector<16x1xi32>
    %5 = arith.extui %4 : vector<16x1xi1> to vector<16x1xi32>
    %6 = arith.sitofp %5 : vector<16x1xi32> to vector<16x1xf32>
    %7 = vector.broadcast %6 : vector<16x1xf32> to vector<16x256xf32>
    %8 = vector.broadcast %2 : vector<1x256xf32> to vector<16x256xf32>
    %9 = arith.mulf %7, %8 : vector<16x256xf32>
    %10 = arith.addf %1, %9 : vector<16x256xf32>
    %c1 = arith.constant 1 : index
    %c0_3 = arith.constant 0 : index
    %11 = vector.load %arg2[%c1, %c0_3] : memref<3x256xf32, #tpu.memory_space<vmem>>, vector<1x256xf32>
    %c1_i32 = arith.constant 1 : i32
    %12 = vector.broadcast %c1_i32 : i32 to vector<16x1xi32>
    %13 = arith.cmpi eq, %0, %12 : vector<16x1xi32>
    %14 = arith.extui %13 : vector<16x1xi1> to vector<16x1xi32>
    %15 = arith.sitofp %14 : vector<16x1xi32> to vector<16x1xf32>
    %16 = vector.broadcast %15 : vector<16x1xf32> to vector<16x256xf32>
    %17 = vector.broadcast %11 : vector<1x256xf32> to vector<16x256xf32>
    %18 = arith.mulf %16, %17 : vector<16x256xf32>
    %19 = arith.addf %10, %18 : vector<16x256xf32>
    %c2 = arith.constant 2 : index
    %c0_4 = arith.constant 0 : index
    %20 = vector.load %arg2[%c2, %c0_4] : memref<3x256xf32, #tpu.memory_space<vmem>>, vector<1x256xf32>
    %c2_i32 = arith.constant 2 : i32
    %21 = vector.broadcast %c2_i32 : i32 to vector<16x1xi32>
    %22 = arith.cmpi eq, %0, %21 : vector<16x1xi32>
    %23 = arith.extui %22 : vector<16x1xi1> to vector<16x1xi32>
    %24 = arith.sitofp %23 : vector<16x1xi32> to vector<16x1xf32>
    %25 = vector.broadcast %24 : vector<16x1xf32> to vector<16x256xf32>
    %26 = vector.broadcast %20 : vector<1x256xf32> to vector<16x256xf32>
    %27 = arith.mulf %25, %26 : vector<16x256xf32>
    %28 = arith.addf %19, %27 : vector<16x256xf32>
    %c0_5 = arith.constant 0 : index
    %c0_6 = arith.constant 0 : index
    %29 = vector.load %arg3[%c0_5, %c0_6] : memref<16x256xf32, #tpu.memory_space<vmem>>, vector<16x256xf32>
    tpu.vector_store %arg3[%c0_5, %c0_6], %28 {strides = array<i32>} : memref<16x256xf32, #tpu.memory_space<vmem>>, vector<16x256xf32>,
    return
  }
  func.func @transform_0(%arg0: i32) -> (i32, i32) {
    %c0_i32 = arith.constant 0 : i32
    %c0_i32_0 = arith.constant 0 : i32
    return %arg0, %c0_i32 : i32, i32
  }
  func.func @transform_1(%arg0: i32) -> (i32, i32) {
    %c0_i32 = arith.constant 0 : i32
    %c0_i32_0 = arith.constant 0 : i32
    %c0_i32_1 = arith.constant 0 : i32
    return %c0_i32, %c0_i32_0 : i32, i32
  }
  func.func @transform_2(%arg0: i32) -> (i32, i32) {
    %c0_i32 = arith.constant 0 : i32
    %c0_i32_0 = arith.constant 0 : i32
    return %arg0, %c0_i32 : i32, i32
  }
}

</mosaic_0001>

<bundles_post_ra>
// kernel: tpu_custom_call.1
= control target key start
LH: loop header
LB: loop body
LE: loop exit
PB: predicated region body
PF: predicated region fallthrough
CT: control target
= control target key end

     0   :  { %s234_s0 = inlined_call_operand.vmem [shape: s32[16,1], index: 0, kind: input, shape index: {}]   ;;  %s235_s1 = inlined_call_operand.vmem [shape: f32[3,256], index: 1, kind: input, shape index: {}]   ;;  %s236_s2 = inlined_call_operand.hbm [shape: f32[16,256], index: 2, kind: output, shape index: {}]  }
   0x1   :  { %v12_v0 = vld [vmem:[%s234_s0] sm:$0xff]  ;;  %v13_v1 = vld [vmem:[%s234_s0 + $0x8] sm:$0xff] }
   0x2   :  { %7 = vsyncpa [#allocation3], 0  ;;  %v196_v2 = vmov 0   ;;  %vm15_vm0 = vcmp.eq.s32.totalorder %v12_v0, 0  ;;  %vm16_vm1 = vcmp.eq.s32.totalorder %v13_v1, 0  ;;  %vm52_vm2 = vcmp.eq.s32.totalorder %v12_v0, 1 }
   0x3   :  { %157 = vset.pattern.permute.xlu0 %v196_v2  ;;  %vm53_vm3 = vcmp.eq.s32.totalorder %v13_v1, 1  ;;  %168 = vset.pattern.permute.xlu1 %v196_v2  ;;  %v197_v3 = vmov 0.0   ;;  %vm89_vm4 = vcmp.eq.s32.totalorder %v12_v0, 2  ;;  %vm90_vm5 = vcmp.eq.s32.totalorder %v13_v1, 2 }
   0x4   :  { %v144_v4 = vsel %vm15_vm0, 1.0, %v197_v3  ;;  %v145_v5 = vsel %vm16_vm1, 1.0, %v197_v3  ;;  %v147_v6 = vsel %vm52_vm2, 1.0, %v197_v3  ;;  %v148_v7 = vsel %vm53_vm3, 1.0, %v197_v3 }
   0x5   :  { %v158_v8 = vpack.i.bf16 %v145_v5, %v144_v4  ;;  %v150_v9 = vsel %vm89_vm4, 1.0, %v197_v3  ;;  %v151_v10 = vsel %vm90_vm5, 1.0, %v197_v3  ;;  %v163_v11 = vpack.i.bf16 %v148_v7, %v147_v6  ;;  %v14_v17 = vld [vmem:[%s235_s1] ss:$4 sm:$0x3] }
   0x6   :  { %v169_v12 = vpack.i.bf16 %v151_v10, %v150_v9  ;;  %v32_v13 = vlaneseq  ;;  %v149_v18 = vld [vmem:[%s235_s1 + $0x2] ss:$4 sm:$0x3]  ;;  %v146_v22 = vld [vmem:[%s235_s1 + $0x1] ss:$4 sm:$0x3] }
   0x7   :  { %159 = vperm.xlu0 %157, %v158_v8   ;;  %s198_s1 = smov [#allocation2]  }
   0x8   :  { %170 = vperm.xlu1 %168, %v169_v12   ;;  %v33_v14 = vshrl.u32 %v32_v13, 7  ;;  %s133_s18 = sshll.u32 %s198_s1, 4  ;;  %s134_s18 = int_to_ptr.vmem [resolvable:$true] %s133_s18 }
   0x9   :  { %s174_s19 = scalar_lea.vmem %s134_s18, 512  ;;  %p179_p1 = scmp.lt.s32.totalorder %s134_s18, %s134_s18 }
   0xa   :  { %v34_v15 = vsub.s32 0, %v33_v14  ;;  %v38_v16 = vsub.s32 1, %v33_v14  ;;  %p175_p0 = scmp.ne.s32.totalorder %s134_s18, %s174_s19  ;;  %p180_p2 = scmp.lt.s32.totalorder %s174_s19, %s174_s19 }
   0xb   :  { %164 = vperm.xlu0 %157, %v163_v11  }
   0xc   :  { %v35_v19 = vrot.slane %v14_v17, %v34_v15  ;;  %v39_v20 = vrot.slane %v14_v17, %v38_v16  ;;  %v109_v25 = vrot.slane %v149_v18, %v34_v15  ;;  %v113_v26 = vrot.slane %v149_v18, %v38_v16  ;;  %p181_p3 = por %p180_p2, %p179_p1 }
   0xd   :  { %v72_v28 = vrot.slane %v146_v22, %v34_v15  ;;  %v76_v29 = vrot.slane %v146_v22, %v38_v16 }
   0xe   :  { %p182_p4 = pnand %p181_p3, %p175_p0 }
  0x82   :  { %v160_v21 = vpop.permute.xlu0 %159 }
  0x83   :  { %v162_v23 = vunpack.i.h.bf16 %v160_v21  ;;  %v161_v24 = vunpack.i.l.bf16 %v160_v21  ;;  %v171_v27 = vpop.permute.xlu1 %170 }
  0x84   :  { %v173_v33 = vunpack.i.h.bf16 %v171_v27  ;;  %v172_v34 = vunpack.i.l.bf16 %v171_v27 }
  0x85   :  { %v44_v30 = vmul.f32 %v162_v23, %v35_v19  ;;  %v45_v31 = vmul.f32 %v162_v23, %v39_v20  ;;  %v42_v35 = vmul.f32 %v161_v24, %v35_v19  ;;  %v43_v36 = vmul.f32 %v161_v24, %v39_v20 }
  0x86   :  { %v165_v32 = vpop.permute.xlu0 %164  ;;  %v118_v39 = vmul.f32 %v173_v33, %v109_v25  ;;  %v119_v40 = vmul.f32 %v173_v33, %v113_v26  ;;  %v116_v41 = vmul.f32 %v172_v34, %v109_v25  ;;  %v117_v42 = vmul.f32 %v172_v34, %v113_v26 }
  0x87   :  { %v167_v37 = vunpack.i.h.bf16 %v165_v32  ;;  %v166_v38 = vunpack.i.l.bf16 %v165_v32 }
  0x89   :  { %v81_v43 = vmul.f32 %v167_v37, %v72_v28  ;;  %v82_v44 = vmul.f32 %v167_v37, %v76_v29  ;;  %v79_v45 = vmul.f32 %v166_v38, %v72_v28  ;;  %v80_v46 = vmul.f32 %v166_v38, %v76_v29 }
  0x8b   :  { %v83_v47 = vadd.f32 %v79_v45, %v42_v35  ;;  %v84_v48 = vadd.f32 %v80_v46, %v43_v36  ;;  %v85_v49 = vadd.f32 %v81_v43, %v44_v30  ;;  %v86_v50 = vadd.f32 %v82_v44, %v45_v31 }
  0x8d   :  { %v120_v51 = vadd.f32 %v116_v41, %v83_v47  ;;  %v121_v52 = vadd.f32 %v117_v42, %v84_v48  ;;  %v122_v53 = vadd.f32 %v118_v39, %v85_v49  ;;  %v123_v54 = vadd.f32 %v119_v40, %v86_v50 }
  0x8f   :  { %124 = vst [vmem:[#allocation2] sm:$0xff] %v120_v51  ;;  %125 = vst [vmem:[#allocation2 + $0x8] sm:$0xff] %v121_v52 }
  0x90   :  { %126 = vst [vmem:[#allocation2 + $0x10] sm:$0xff] %v122_v53  ;;  %127 = vst [vmem:[#allocation2 + $0x18] sm:$0xff] %v123_v54 }
  0x91   :  { %185 = shalt.err (!%p182_p4)
}
  0x92   :  { %s199_s20 = smov 256   ;;  %s200_s21 = smov 16  }
  0x93   :  { %139 = dma.vmem_to_hbm [thread:$0]  %s134_s18, 512, %s236_s2, [#allocation3], %s199_s20, %s199_s20, %s200_s21  }
  0x94   :  { %194 = dma.done.wait [#allocation3], 512  }
  0x95   :  { %195 = vsyncadd [#allocation3], 4294966784 }
  0x96   :  { %143 = vsyncpa [#allocation3], 1 }

</bundles_post_ra>
